<compile_context>
chip_gen: v5e
topology: v5e:2x2
jax: 0.10.0
libtpu: 0.0.40
codegen_flags: <defaults>
</compile_context>

<pallas_src>
import functools
import math

import jax
import jax.numpy as jnp
from jax.experimental import pallas as pl
from jax.experimental.pallas import tpu as pltpu

# ----- small shapes consistent with the module -----
VOCAB = 64      # vocab
D_MODEL = 32    # d_model
SEQ = 8         # sequence length
BATCH = 2       # batch size


# ----------------------- path 1: small table, VMEM direct gather -----------------------
def _vmem_gather_kernel(ids_ref, table_ref, o_ref, *, scale, n_tokens, d_model, per_row):
    # ids_ref:   (N,)  int32  in SMEM  (cheap scalar-indexed reads)
    # table_ref: (V, D) float in VMEM  (whole table, DMA'd once)
    # o_ref:     (N*D/out_cols, out_cols) lane-dense slab (out_cols = 128 if possible)
    for i in range(n_tokens):                       # static unroll, N is small
        row = ids_ref[i]                            # scalar token id from SMEM
        emb = table_ref[pl.ds(row, 1), :] * scale   # (1, D) dynamic row read, scale fused
        r = i // per_row                            # static output row
        c = (i % per_row) * d_model                 # static lane offset
        o_ref[pl.ds(r, 1), pl.ds(c, d_model)] = emb.astype(o_ref.dtype)


def _embedding_vmem_gather(ids, table, *, scale):
    (n,) = ids.shape
    vocab, d_model = table.shape

    # Lane-dense output slab when the sizes allow it (last dim multiple of 128).
    if (n * d_model) % 128 == 0 and 128 % d_model == 0:
        out_cols = 128
    else:
        out_cols = d_model
    per_row = out_cols // d_model
    out_rows = (n * d_model) // out_cols

    kernel = functools.partial(_vmem_gather_kernel, scale=scale, n_tokens=n,
                               d_model=d_model, per_row=per_row)
    out = pl.pallas_call(
        kernel,
        out_shape=jax.ShapeDtypeStruct((out_rows, out_cols), table.dtype),
        in_specs=[pl.BlockSpec(memory_space=pltpu.MemorySpace.SMEM),   # ids   (N,)
                  pl.BlockSpec(memory_space=pltpu.MemorySpace.VMEM)],  # table (V, D)
        out_specs=pl.BlockSpec(memory_space=pltpu.MemorySpace.VMEM),
    )(ids, table)
    return out.reshape(n, d_model)


# ----------------- path 2: large table, HBM row gather via scalar prefetch -----------------
def _hbm_gather_kernel(ids_smem_ref, row_ref, o_ref, *, scale):
    # row_ref: (1, 1, D) — the single table row gathered for this token by the BlockSpec DMA.
    del ids_smem_ref  # only needed by the index_maps
    o_ref[...] = (row_ref[...] * scale).astype(o_ref.dtype)


def _embedding_hbm_gather(ids, table, *, scale):
    (n,) = ids.shape
    vocab, d_model = table.shape
    # Reshape to (V, 1, D) so the block's last two dims equal the full array dims.
    table3 = table.reshape(vocab, 1, d_model)

    kernel = functools.partial(_hbm_gather_kernel, scale=scale)
    grid_spec = pltpu.PrefetchScalarGridSpec(
        num_scalar_prefetch=1,                       # ids -> SMEM, passed to index_maps
        grid=(n,),                                   # one token per grid step
        in_specs=[pl.BlockSpec((1, 1, d_model),
                               lambda i, ids_ref: (ids_ref[i], 0, 0))],  # row gather
        out_specs=pl.BlockSpec((1, 1, d_model),
                               lambda i, ids_ref: (i, 0, 0)),
    )
    out = pl.pallas_call(
        kernel,
        out_shape=jax.ShapeDtypeStruct((n, 1, d_model), table.dtype),
        grid_spec=grid_spec,
        compiler_params=pltpu.CompilerParams(
            dimension_semantics=("parallel",)),      # v7x: shard tokens across both cores
    )(ids, table3)
    return out.reshape(n, d_model)


# ------------------------------------- wrapper ---------------------------------------------
def embedding_forward(x_ids, table, *, path="auto"):
    """Embedding.forward ('nn' branch): table[x] * sqrt(d_model), x of any leading shape."""
    vocab, d_model = table.shape
    lead_shape = x_ids.shape
    n = int(x_ids.size)
    ids = x_ids.reshape(n).astype(jnp.int32)
    scale = math.sqrt(float(d_model))

    if path == "auto":
        # Keep the full table resident in VMEM only while it is comfortably small.
        table_bytes = int(table.size) * table.dtype.itemsize
        path = "vmem_gather" if table_bytes <= 4 * 1024 * 1024 else "hbm_gather"

    if path == "vmem_gather":
        out2d = _embedding_vmem_gather(ids, table, scale=scale)
    elif path == "hbm_gather":
        out2d = _embedding_hbm_gather(ids, table, scale=scale)
    else:
        raise ValueError(f"unknown path: {path}")
    return out2d.reshape(*lead_shape, d_model)


# --------------------------------------- main ----------------------------------------------
if __name__ == "__main__":
    key = jax.random.PRNGKey(0)
    k_idx, k_w = jax.random.split(key)

    # PyTorch transformer convention: x is (seq_len, batch) of token indices.
    x = jax.random.randint(k_idx, (SEQ, BATCH), 0, VOCAB, dtype=jnp.int32)
    # nn.Embedding weight, init_weights(): uniform(-0.1, 0.1)
    table = jax.random.uniform(k_w, (VOCAB, D_MODEL), jnp.float32, -0.1, 0.1)

    # pure-JAX reference
    ref = jnp.take(table, x, axis=0) * math.sqrt(float(D_MODEL))

    # Path 1: in-VMEM direct gather (auto-dispatch picks this at toy sizes).
    out_small = jax.block_until_ready(embedding_forward(x, table))
    assert out_small.shape == (SEQ, BATCH, D_MODEL), out_small.shape
    assert jnp.allclose(out_small, ref, atol=1e-6, rtol=1e-6), \
        float(jnp.max(jnp.abs(out_small - ref)))

    # Path 2: scalar-prefetch HBM row gather (the scalable design) — verified on same data.
    out_big = jax.block_until_ready(embedding_forward(x, table, path="hbm_gather"))
    assert out_big.shape == (SEQ, BATCH, D_MODEL), out_big.shape
    assert jnp.allclose(out_big, ref, atol=1e-6, rtol=1e-6), \
        float(jnp.max(jnp.abs(out_big - ref)))

    print("KERNEL_OK")
</pallas_src>

<mosaic_0001>
module attributes {stable_mosaic.version = 11 : i64} {
  func.func @_vmem_gather_kernel(%arg0: memref<16xi32, #tpu.memory_space<smem>>, %arg1: memref<64x32xf32, #tpu.memory_space<vmem>>, %arg2: memref<4x128xf32, #tpu.memory_space<vmem>>) attributes {dimension_semantics = [], scalar_prefetch = 0 : i64, scratch_operands = 0 : i64, tpu.core_type = #tpu.core_type<tc>} {
    %c0 = arith.constant 0 : index
    %0 = memref.load %arg0[%c0] : memref<16xi32, #tpu.memory_space<smem>>
    %1 = arith.index_cast %0 : i32 to index
    %c0_0 = arith.constant 0 : index
    %2 = vector.load %arg1[%1, %c0_0] : memref<64x32xf32, #tpu.memory_space<vmem>>, vector<1x32xf32>
    %cst = arith.constant 5.65685415 : f32
    %3 = vector.broadcast %cst : f32 to vector<1x32xf32>
    %4 = arith.mulf %2, %3 : vector<1x32xf32>
    %c0_1 = arith.constant 0 : index
    %c0_2 = arith.constant 0 : index
    %5 = vector.load %arg2[%c0_1, %c0_2] : memref<4x128xf32, #tpu.memory_space<vmem>>, vector<1x32xf32>
    tpu.vector_store %arg2[%c0_1, %c0_2], %4 {strides = array<i32>} : memref<4x128xf32, #tpu.memory_space<vmem>>, vector<1x32xf32>,
    %c1 = arith.constant 1 : index
    %6 = memref.load %arg0[%c1] : memref<16xi32, #tpu.memory_space<smem>>
    %7 = arith.index_cast %6 : i32 to index
    %c0_3 = arith.constant 0 : index
    %8 = vector.load %arg1[%7, %c0_3] : memref<64x32xf32, #tpu.memory_space<vmem>>, vector<1x32xf32>
    %cst_4 = arith.constant 5.65685415 : f32
    %9 = vector.broadcast %cst_4 : f32 to vector<1x32xf32>
    %10 = arith.mulf %8, %9 : vector<1x32xf32>
    %c0_5 = arith.constant 0 : index
    %c32 = arith.constant 32 : index
    %11 = vector.load %arg2[%c0_5, %c32] : memref<4x128xf32, #tpu.memory_space<vmem>>, vector<1x32xf32>
    tpu.vector_store %arg2[%c0_5, %c32], %10 {strides = array<i32>} : memref<4x128xf32, #tpu.memory_space<vmem>>, vector<1x32xf32>,
    %c2 = arith.constant 2 : index
    %12 = memref.load %arg0[%c2] : memref<16xi32, #tpu.memory_space<smem>>
    %13 = arith.index_cast %12 : i32 to index
    %c0_6 = arith.constant 0 : index
    %14 = vector.load %arg1[%13, %c0_6] : memref<64x32xf32, #tpu.memory_space<vmem>>, vector<1x32xf32>
    %cst_7 = arith.constant 5.65685415 : f32
    %15 = vector.broadcast %cst_7 : f32 to vector<1x32xf32>
    %16 = arith.mulf %14, %15 : vector<1x32xf32>
    %c0_8 = arith.constant 0 : index
    %c64 = arith.constant 64 : index
    %17 = vector.load %arg2[%c0_8, %c64] : memref<4x128xf32, #tpu.memory_space<vmem>>, vector<1x32xf32>
    tpu.vector_store %arg2[%c0_8, %c64], %16 {strides = array<i32>} : memref<4x128xf32, #tpu.memory_space<vmem>>, vector<1x32xf32>,
    %c3 = arith.constant 3 : index
    %18 = memref.load %arg0[%c3] : memref<16xi32, #tpu.memory_space<smem>>
    %19 = arith.index_cast %18 : i32 to index
    %c0_9 = arith.constant 0 : index
    %20 = vector.load %arg1[%19, %c0_9] : memref<64x32xf32, #tpu.memory_space<vmem>>, vector<1x32xf32>
    %cst_10 = arith.constant 5.65685415 : f32
    %21 = vector.broadcast %cst_10 : f32 to vector<1x32xf32>
    %22 = arith.mulf %20, %21 : vector<1x32xf32>
    %c0_11 = arith.constant 0 : index
    %c96 = arith.constant 96 : index
    %23 = vector.load %arg2[%c0_11, %c96] : memref<4x128xf32, #tpu.memory_space<vmem>>, vector<1x32xf32>
    tpu.vector_store %arg2[%c0_11, %c96], %22 {strides = array<i32>} : memref<4x128xf32, #tpu.memory_space<vmem>>, vector<1x32xf32>,
    %c4 = arith.constant 4 : index
    %24 = memref.load %arg0[%c4] : memref<16xi32, #tpu.memory_space<smem>>
    %25 = arith.index_cast %24 : i32 to index
    %c0_12 = arith.constant 0 : index
    %26 = vector.load %arg1[%25, %c0_12] : memref<64x32xf32, #tpu.memory_space<vmem>>, vector<1x32xf32>
    %cst_13 = arith.constant 5.65685415 : f32
    %27 = vector.broadcast %cst_13 : f32 to vector<1x32xf32>
    %28 = arith.mulf %26, %27 : vector<1x32xf32>
    %c1_14 = arith.constant 1 : index
    %c0_15 = arith.constant 0 : index
    %29 = vector.load %arg2[%c1_14, %c0_15] : memref<4x128xf32, #tpu.memory_space<vmem>>, vector<1x32xf32>
    tpu.vector_store %arg2[%c1_14, %c0_15], %28 {strides = array<i32>} : memref<4x128xf32, #tpu.memory_space<vmem>>, vector<1x32xf32>,
    %c5 = arith.constant 5 : index
    %30 = memref.load %arg0[%c5] : memref<16xi32, #tpu.memory_space<smem>>
    %31 = arith.index_cast %30 : i32 to index
    %c0_16 = arith.constant 0 : index
    %32 = vector.load %arg1[%31, %c0_16] : memref<64x32xf32, #tpu.memory_space<vmem>>, vector<1x32xf32>
    %cst_17 = arith.constant 5.65685415 : f32
    %33 = vector.broadcast %cst_17 : f32 to vector<1x32xf32>
    %34 = arith.mulf %32, %33 : vector<1x32xf32>
    %c1_18 = arith.constant 1 : index
    %c32_19 = arith.constant 32 : index
    %35 = vector.load %arg2[%c1_18, %c32_19] : memref<4x128xf32, #tpu.memory_space<vmem>>, vector<1x32xf32>
    tpu.vector_store %arg2[%c1_18, %c32_19], %34 {strides = array<i32>} : memref<4x128xf32, #tpu.memory_space<vmem>>, vector<1x32xf32>,
    %c6 = arith.constant 6 : index
    %36 = memref.load %arg0[%c6] : memref<16xi32, #tpu.memory_space<smem>>
    %37 = arith.index_cast %36 : i32 to index
    %c0_20 = arith.constant 0 : index
    %38 = vector.load %arg1[%37, %c0_20] : memref<64x32xf32, #tpu.memory_space<vmem>>, vector<1x32xf32>
    %cst_21 = arith.constant 5.65685415 : f32
    %39 = vector.broadcast %cst_21 : f32 to vector<1x32xf32>
    %40 = arith.mulf %38, %39 : vector<1x32xf32>
    %c1_22 = arith.constant 1 : index
    %c64_23 = arith.constant 64 : index
    %41 = vector.load %arg2[%c1_22, %c64_23] : memref<4x128xf32, #tpu.memory_space<vmem>>, vector<1x32xf32>
    tpu.vector_store %arg2[%c1_22, %c64_23], %40 {strides = array<i32>} : memref<4x128xf32, #tpu.memory_space<vmem>>, vector<1x32xf32>,
    %c7 = arith.constant 7 : index
    %42 = memref.load %arg0[%c7] : memref<16xi32, #tpu.memory_space<smem>>
    %43 = arith.index_cast %42 : i32 to index
    %c0_24 = arith.constant 0 : index
    %44 = vector.load %arg1[%43, %c0_24] : memref<64x32xf32, #tpu.memory_space<vmem>>, vector<1x32xf32>
    %cst_25 = arith.constant 5.65685415 : f32
    %45 = vector.broadcast %cst_25 : f32 to vector<1x32xf32>
    %46 = arith.mulf %44, %45 : vector<1x32xf32>
    %c1_26 = arith.constant 1 : index
    %c96_27 = arith.constant 96 : index
    %47 = vector.load %arg2[%c1_26, %c96_27] : memref<4x128xf32, #tpu.memory_space<vmem>>, vector<1x32xf32>
    tpu.vector_store %arg2[%c1_26, %c96_27], %46 {strides = array<i32>} : memref<4x128xf32, #tpu.memory_space<vmem>>, vector<1x32xf32>,
    %c8 = arith.constant 8 : index
    %48 = memref.load %arg0[%c8] : memref<16xi32, #tpu.memory_space<smem>>
    %49 = arith.index_cast %48 : i32 to index
    %c0_28 = arith.constant 0 : index
    %50 = vector.load %arg1[%49, %c0_28] : memref<64x32xf32, #tpu.memory_space<vmem>>, vector<1x32xf32>
    %cst_29 = arith.constant 5.65685415 : f32
    %51 = vector.broadcast %cst_29 : f32 to vector<1x32xf32>
    %52 = arith.mulf %50, %51 : vector<1x32xf32>
    %c2_30 = arith.constant 2 : index
    %c0_31 = arith.constant 0 : index
    %53 = vector.load %arg2[%c2_30, %c0_31] : memref<4x128xf32, #tpu.memory_space<vmem>>, vector<1x32xf32>
    tpu.vector_store %arg2[%c2_30, %c0_31], %52 {strides = array<i32>} : memref<4x128xf32, #tpu.memory_space<vmem>>, vector<1x32xf32>,
    %c9 = arith.constant 9 : index
    %54 = memref.load %arg0[%c9] : memref<16xi32, #tpu.memory_space<smem>>
    %55 = arith.index_cast %54 : i32 to index
    %c0_32 = arith.constant 0 : index
    %56 = vector.load %arg1[%55, %c0_32] : memref<64x32xf32, #tpu.memory_space<vmem>>, vector<1x32xf32>
    %cst_33 = arith.constant 5.65685415 : f32
    %57 = vector.broadcast %cst_33 : f32 to vector<1x32xf32>
    %58 = arith.mulf %56, %57 : vector<1x32xf32>
    %c2_34 = arith.constant 2 : index
    %c32_35 = arith.constant 32 : index
    %59 = vector.load %arg2[%c2_34, %c32_35] : memref<4x128xf32, #tpu.memory_space<vmem>>, vector<1x32xf32>
    tpu.vector_store %arg2[%c2_34, %c32_35], %58 {strides = array<i32>} : memref<4x128xf32, #tpu.memory_space<vmem>>, vector<1x32xf32>,
    %c10 = arith.constant 10 : index
    %60 = memref.load %arg0[%c10] : memref<16xi32, #tpu.memory_space<smem>>
    %61 = arith.index_cast %60 : i32 to index
    %c0_36 = arith.constant 0 : index
    %62 = vector.load %arg1[%61, %c0_36] : memref<64x32xf32, #tpu.memory_space<vmem>>, vector<1x32xf32>
    %cst_37 = arith.constant 5.65685415 : f32
    %63 = vector.broadcast %cst_37 : f32 to vector<1x32xf32>
    %64 = arith.mulf %62, %63 : vector<1x32xf32>
    %c2_38 = arith.constant 2 : index
    %c64_39 = arith.constant 64 : index
    %65 = vector.load %arg2[%c2_38, %c64_39] : memref<4x128xf32, #tpu.memory_space<vmem>>, vector<1x32xf32>
    tpu.vector_store %arg2[%c2_38, %c64_39], %64 {strides = array<i32>} : memref<4x128xf32, #tpu.memory_space<vmem>>, vector<1x32xf32>,
    %c11 = arith.constant 11 : index
    %66 = memref.load %arg0[%c11] : memref<16xi32, #tpu.memory_space<smem>>
    %67 = arith.index_cast %66 : i32 to index
    %c0_40 = arith.constant 0 : index
    %68 = vector.load %arg1[%67, %c0_40] : memref<64x32xf32, #tpu.memory_space<vmem>>, vector<1x32xf32>
    %cst_41 = arith.constant 5.65685415 : f32
    %69 = vector.broadcast %cst_41 : f32 to vector<1x32xf32>
    %70 = arith.mulf %68, %69 : vector<1x32xf32>
    %c2_42 = arith.constant 2 : index
    %c96_43 = arith.constant 96 : index
    %71 = vector.load %arg2[%c2_42, %c96_43] : memref<4x128xf32, #tpu.memory_space<vmem>>, vector<1x32xf32>
    tpu.vector_store %arg2[%c2_42, %c96_43], %70 {strides = array<i32>} : memref<4x128xf32, #tpu.memory_space<vmem>>, vector<1x32xf32>,
    %c12 = arith.constant 12 : index
    %72 = memref.load %arg0[%c12] : memref<16xi32, #tpu.memory_space<smem>>
    %73 = arith.index_cast %72 : i32 to index
    %c0_44 = arith.constant 0 : index
    %74 = vector.load %arg1[%73, %c0_44] : memref<64x32xf32, #tpu.memory_space<vmem>>, vector<1x32xf32>
    %cst_45 = arith.constant 5.65685415 : f32
    %75 = vector.broadcast %cst_45 : f32 to vector<1x32xf32>
    %76 = arith.mulf %74, %75 : vector<1x32xf32>
    %c3_46 = arith.constant 3 : index
    %c0_47 = arith.constant 0 : index
    %77 = vector.load %arg2[%c3_46, %c0_47] : memref<4x128xf32, #tpu.memory_space<vmem>>, vector<1x32xf32>
    tpu.vector_store %arg2[%c3_46, %c0_47], %76 {strides = array<i32>} : memref<4x128xf32, #tpu.memory_space<vmem>>, vector<1x32xf32>,
    %c13 = arith.constant 13 : index
    %78 = memref.load %arg0[%c13] : memref<16xi32, #tpu.memory_space<smem>>
    %79 = arith.index_cast %78 : i32 to index
    %c0_48 = arith.constant 0 : index
    %80 = vector.load %arg1[%79, %c0_48] : memref<64x32xf32, #tpu.memory_space<vmem>>, vector<1x32xf32>
    %cst_49 = arith.constant 5.65685415 : f32
    %81 = vector.broadcast %cst_49 : f32 to vector<1x32xf32>
    %82 = arith.mulf %80, %81 : vector<1x32xf32>
    %c3_50 = arith.constant 3 : index
    %c32_51 = arith.constant 32 : index
    %83 = vector.load %arg2[%c3_50, %c32_51] : memref<4x128xf32, #tpu.memory_space<vmem>>, vector<1x32xf32>
    tpu.vector_store %arg2[%c3_50, %c32_51], %82 {strides = array<i32>} : memref<4x128xf32, #tpu.memory_space<vmem>>, vector<1x32xf32>,
    %c14 = arith.constant 14 : index
    %84 = memref.load %arg0[%c14] : memref<16xi32, #tpu.memory_space<smem>>
    %85 = arith.index_cast %84 : i32 to index
    %c0_52 = arith.constant 0 : index
    %86 = vector.load %arg1[%85, %c0_52] : memref<64x32xf32, #tpu.memory_space<vmem>>, vector<1x32xf32>
    %cst_53 = arith.constant 5.65685415 : f32
    %87 = vector.broadcast %cst_53 : f32 to vector<1x32xf32>
    %88 = arith.mulf %86, %87 : vector<1x32xf32>
    %c3_54 = arith.constant 3 : index
    %c64_55 = arith.constant 64 : index
    %89 = vector.load %arg2[%c3_54, %c64_55] : memref<4x128xf32, #tpu.memory_space<vmem>>, vector<1x32xf32>
    tpu.vector_store %arg2[%c3_54, %c64_55], %88 {strides = array<i32>} : memref<4x128xf32, #tpu.memory_space<vmem>>, vector<1x32xf32>,
    %c15 = arith.constant 15 : index
    %90 = memref.load %arg0[%c15] : memref<16xi32, #tpu.memory_space<smem>>
    %91 = arith.index_cast %90 : i32 to index
    %c0_56 = arith.constant 0 : index
    %92 = vector.load %arg1[%91, %c0_56] : memref<64x32xf32, #tpu.memory_space<vmem>>, vector<1x32xf32>
    %cst_57 = arith.constant 5.65685415 : f32
    %93 = vector.broadcast %cst_57 : f32 to vector<1x32xf32>
    %94 = arith.mulf %92, %93 : vector<1x32xf32>
    %c3_58 = arith.constant 3 : index
    %c96_59 = arith.constant 96 : index
    %95 = vector.load %arg2[%c3_58, %c96_59] : memref<4x128xf32, #tpu.memory_space<vmem>>, vector<1x32xf32>
    tpu.vector_store %arg2[%c3_58, %c96_59], %94 {strides = array<i32>} : memref<4x128xf32, #tpu.memory_space<vmem>>, vector<1x32xf32>,
    return
  }
}

</mosaic_0001>

<bundles_post_ra>
// kernel: tpu_custom_call.1
= control target key start
LH: loop header
LB: loop body
LE: loop exit
PB: predicated region body
PF: predicated region fallthrough
CT: control target
= control target key end

     0   :  { %7 = vsyncpa [#allocation4], 0  ;;  %s335_s0 = inlined_call_operand.vmem [shape: s32[16], index: 0, kind: input, shape index: {}]   ;;  %s336_s1 = inlined_call_operand.vmem [shape: f32[64,32], index: 1, kind: input, shape index: {}]   ;;  %s337_s2 = inlined_call_operand.hbm [shape: f32[4,128], index: 2, kind: output, shape index: {}]  }
   0x1   :  { %8 = vsyncpa [#allocation3], 0  ;;  %s14_s11 = sshll.u32 %s335_s0, 4  ;;  %s250_s12 = smov [#allocation2]   ;;  %s15_s11 = int_to_ptr.vmem [resolvable:$true] %s14_s11 }
   0x2   :  { %17 = dma.vmem_to_smem %s15_s11, 16, %s250_s12, [#allocation4]  }
   0x3   :  { %246 = dma.done.wait [#allocation4], 16  }
   0x4   :  { %247 = vsyncadd [#allocation4], 4294967280 }
   0x5   :  { %24 = sfence }
   0x6   :  { %s198_s13 = sld [smem:[#allocation2 + $0x9]]  ;;  %s251_s4 = smov 32   ;;  %vm29_vm0 = vcmask 253952   ;;  %vm39_vm1 = vcmask 516352   ;;  %vm49_vm2 = vcmask 778752   ;;  %vm59_vm3 = vcmask 1041152  }
   0x7   :  { %s190_s14 = sld [smem:[#allocation2 + $0x1]]  ;;  %s253_s5 = smov 96  }
   0x8   :  { %s202_s15 = sld [smem:[#allocation2 + $0xd]]  ;;  %s164_s24 = sshll.u32 %s337_s2, 4  ;;  %s165_s24 = int_to_ptr.hbm [resolvable:$true] %s164_s24 }
   0x9   :  { %s194_s16 = sld [smem:[#allocation2 + $0x5]] }
   0xa   :  { %s191_s20 = sld [smem:[#allocation2 + $0x2]] }
   0xb   :  { %s279_s23 = sld [smem:[#allocation2 + $0xe]] }
   0xc   :  { %s99_s19 = scalar_lea.vmem %s336_s1, %s198_s13  ;;  %s199_s27 = sld [smem:[#allocation2 + $0xa]] }
   0xd   :  { %v100_v0 = vld [vmem:[%s99_s19] sm:$0x1]  ;;  %s32_s0 = scalar_lea.vmem %s336_s1, %s190_s14  ;;  %s195_s3 = sld [smem:[#allocation2 + $0x6]] }
   0xe   :  { %v101_v1 = vmul.f32 5.656854, %v100_v0  ;;  %v33_v2 = vld [vmem:[%s32_s0] sm:$0x1]  ;;  %s131_s26 = scalar_lea.vmem %s336_s1, %s202_s15  ;;  %s192_s8 = sld [smem:[#allocation2 + $0x3]] }
   0xf   :  { %v34_v3 = vmul.f32 5.656854, %v33_v2  ;;  %s67_s30 = scalar_lea.vmem %s336_s1, %s194_s16  ;;  %v132_v4 = vld [vmem:[%s131_s26] sm:$0x1]  ;;  %s252_s15 = smov 64  }
  0x10   :  { %103 = vrot.lane.b32.xlu1 %v101_v1, %s251_s4  ;;  %v68_v5 = vld [vmem:[%s67_s30] sm:$0x1]  ;;  %s42_s7 = scalar_lea.vmem %s336_s1, %s191_s20  ;;  %v133_v7 = vmul.f32 5.656854, %v132_v4  ;;  %s200_s16 = sld [smem:[#allocation2 + $0xb]] }
  0x11   :  { %36 = vrot.lane.b32.xlu0 %v34_v3, %s251_s4  ;;  %v43_v6 = vld [vmem:[%s42_s7] sm:$0x1]  ;;  %v69_v9 = vmul.f32 5.656854, %v68_v5  ;;  %s140_s14 = scalar_lea.vmem %s336_s1, %s279_s23  ;;  %s196_s20 = sld [smem:[#allocation2 + $0x7]] }
  0x12   :  { %v44_v8 = vmul.f32 5.656854, %v43_v6  ;;  %s108_s19 = scalar_lea.vmem %s336_s1, %s199_s27  ;;  %v141_v11 = vld [vmem:[%s140_s14] sm:$0x1]  ;;  %s204_s23 = sld [smem:[#allocation2 + $0xf]] }
  0x13   :  { %s76_s11 = scalar_lea.vmem %s336_s1, %s195_s3  ;;  %v109_v12 = vld [vmem:[%s108_s19] sm:$0x1]  ;;  %v142_v14 = vmul.f32 5.656854, %v141_v11  ;;  %s197_s6 = sld [smem:[#allocation2 + $0x8]] }
  0x14   :  { %46 = vrot.lane.b32.xlu2 %v44_v8, %s252_s15  ;;  %v77_v10 = vld [vmem:[%s76_s11] sm:$0x1]  ;;  %s52_s0 = scalar_lea.vmem %s336_s1, %s192_s8  ;;  %v110_v15 = vmul.f32 5.656854, %v109_v12  ;;  %s25_s7 = sld [smem:[#allocation2]] }
  0x15   :  { %v78_v13 = vmul.f32 5.656854, %v77_v10  ;;  %v53_v16 = vld [vmem:[%s52_s0] sm:$0x1]  ;;  %s201_s11 = sld [smem:[#allocation2 + $0xc]] }
  0x16   :  { %s117_s26 = scalar_lea.vmem %s336_s1, %s200_s16  ;;  %v54_v19 = vmul.f32 5.656854, %v53_v16 }
  0x17   :  { %s85_s29 = scalar_lea.vmem %s336_s1, %s196_s20  ;;  %v118_v17 = vld [vmem:[%s117_s26] sm:$0x1] }
  0x18   :  { %135 = vrot.lane.b32.xlu1 %v133_v7, %s251_s4  ;;  %v86_v18 = vld [vmem:[%s85_s29] sm:$0x1]  ;;  %v119_v20 = vmul.f32 5.656854, %v118_v17 }
  0x19   :  { %71 = vrot.lane.b32.xlu0 %v69_v9, %s251_s4  ;;  %s149_s4 = scalar_lea.vmem %s336_s1, %s204_s23  ;;  %v87_v21 = vmul.f32 5.656854, %v86_v18  ;;  %s94_s10 = scalar_lea.vmem %s336_s1, %s197_s6 }
  0x1a   :  { %v150_v22 = vld [vmem:[%s149_s4] sm:$0x1]  ;;  %s26_s14 = scalar_lea.vmem %s336_s1, %s25_s7 }
  0x1b   :  { %v151_v23 = vmul.f32 5.656854, %v150_v22  ;;  %v95_v24 = vld [vmem:[%s94_s10] sm:$0x1]  ;;  %s126_s18 = scalar_lea.vmem %s336_s1, %s201_s11 }
  0x1c   :  { %80 = vrot.lane.b32.xlu2 %v78_v13, %s252_s15  ;;  %v96_v25 = vmul.f32 5.656854, %v95_v24  ;;  %v27_v26 = vld [vmem:[%s26_s14] sm:$0x1] }
  0x1d   :  { %v28_v27 = vmul.f32 5.656854, %v27_v26  ;;  %v127_v28 = vld [vmem:[%s126_s18] sm:$0x1] }
  0x1e   :  { %97 = vst.msk [vmem:[#allocation5 + $0x2] sm:$0x1] %vm29_vm0, %v96_v25  ;;  %v128_v29 = vmul.f32 5.656854, %v127_v28 }
  0x1f   :  { %30 = vst.msk [vmem:[#allocation5] sm:$0x1] %vm29_vm0, %v28_v27 }
  0x20   :  { %144 = vrot.lane.b32.xlu1 %v142_v14, %s252_s15  ;;  %129 = vst.msk [vmem:[#allocation5 + $0x3] sm:$0x1] %vm29_vm0, %v128_v29 }
  0x21   :  { %112 = vrot.lane.b32.xlu0 %v110_v15, %s252_s15  ;;  %s193_s15 = sld [smem:[#allocation2 + $0x4]] }
  0x24   :  { %56 = vrot.lane.b32.xlu2 %v54_v19, %s253_s5 }
  0x27   :  { %s62_s21 = scalar_lea.vmem %s336_s1, %s193_s15  ;;  %s254_s1 = smov [#allocation5]  }
  0x28   :  { %121 = vrot.lane.b32.xlu1 %v119_v20, %s253_s5  ;;  %v63_v30 = vld [vmem:[%s62_s21] sm:$0x1]  ;;  %s162_s22 = sshll.u32 %s254_s1, 4  ;;  %s163_s22 = int_to_ptr.vmem [resolvable:$true] %s162_s22 }
  0x29   :  { %89 = vrot.lane.b32.xlu0 %v87_v21, %s253_s5  ;;  %v64_v31 = vmul.f32 5.656854, %v63_v30 }
  0x2b   :  { %65 = vst.msk [vmem:[#allocation5 + $0x1] sm:$0x1] %vm29_vm0, %v64_v31 }
  0x2c   :  { %153 = vrot.lane.b32.xlu2 %v151_v23, %s253_s5 }
  0x6e   :  { %v47_v32 = vpop.permute.xlu2 %46 }
  0x76   :  { %v81_v33 = vpop.permute.xlu2 %80 }
  0x7e   :  { %v57_v36 = vpop.permute.xlu2 %56 }
  0x82   :  { %v104_v34 = vpop.permute.xlu1 %103 }
  0x83   :  { %106 = vst.msk [vmem:[#allocation5 + $0x2] sm:$0x1] %vm39_vm1, %v104_v34  ;;  %v37_v35 = vpop.permute.xlu0 %36 }
  0x84   :  { %40 = vst.msk [vmem:[#allocation5] sm:$0x1] %vm39_vm1, %v37_v35 }
  0x85   :  { %50 = vst.msk [vmem:[#allocation5] sm:$0x1] %vm49_vm2, %v47_v32 }
  0x86   :  { %60 = vst.msk [vmem:[#allocation5] sm:$0x1] %vm59_vm3, %v57_v36  ;;  %v154_v40 = vpop.permute.xlu2 %153 }
  0x8a   :  { %v136_v37 = vpop.permute.xlu1 %135 }
  0x8b   :  { %138 = vst.msk [vmem:[#allocation5 + $0x3] sm:$0x1] %vm39_vm1, %v136_v37  ;;  %v72_v38 = vpop.permute.xlu0 %71 }
  0x8c   :  { %74 = vst.msk [vmem:[#allocation5 + $0x1] sm:$0x1] %vm39_vm1, %v72_v38 }
  0x8d   :  { %83 = vst.msk [vmem:[#allocation5 + $0x1] sm:$0x1] %vm49_vm2, %v81_v33 }
  0x92   :  { %v145_v39 = vpop.permute.xlu1 %144 }
  0x93   :  { %147 = vst.msk [vmem:[#allocation5 + $0x3] sm:$0x1] %vm49_vm2, %v145_v39  ;;  %v113_v41 = vpop.permute.xlu0 %112 }
  0x94   :  { %115 = vst.msk [vmem:[#allocation5 + $0x2] sm:$0x1] %vm49_vm2, %v113_v41 }
  0x95   :  { %156 = vst.msk [vmem:[#allocation5 + $0x3] sm:$0x1] %vm59_vm3, %v154_v40 }
  0x9a   :  { %v122_v42 = vpop.permute.xlu1 %121 }
  0x9b   :  { %124 = vst.msk [vmem:[#allocation5 + $0x2] sm:$0x1] %vm59_vm3, %v122_v42  ;;  %v90_v43 = vpop.permute.xlu0 %89 }
  0x9c   :  { %92 = vst.msk [vmem:[#allocation5 + $0x1] sm:$0x1] %vm59_vm3, %v90_v43 }
  0x9d   :  { %167 = dma.vmem_to_hbm [thread:$0]  %s163_s22, 64, %s165_s24, [#allocation3]  }
  0x9e   :  { %248 = dma.done.wait [#allocation3], 64  }
  0x9f   :  { %249 = vsyncadd [#allocation3], 4294967232 }
  0xa0   :  { %172 = vsyncpa [#allocation3], 1 }
  0xa1   :  { %173 = vsyncpa [#allocation4], 1 }

</bundles_post_ra>
